<compile_context>
chip_gen: v7x
topology: tpu7x:2x2x1
jax: 0.10.0
libtpu: 0.0.40
codegen_flags: <defaults>
</compile_context>

<pallas_src>
import functools

import jax
import jax.numpy as jnp
from jax import lax
from jax.experimental import pallas as pl
from jax.experimental.pallas import tpu as pltpu


# ---------------------------------------------------------------------------
# Kernel bodies
# ---------------------------------------------------------------------------
def _proj_head_body(x_ref, w_ref, b_ref, g_ref, beta_ref, o_ref, bits_ref,
                    *, eps, drop_threshold, keep_scale):
    # Linear: (tm, K) @ (K, N) on the MXU, f32 accumulation.
    y = jnp.dot(x_ref[...], w_ref[...], preferred_element_type=jnp.float32)
    y = y + b_ref[...]

    # One-pass LayerNorm stats over the last dim (biased variance, like PyTorch).
    n_inv = 1.0 / y.shape[-1]
    mean = jnp.sum(y, axis=-1, keepdims=True) * n_inv
    mean_sq = jnp.sum(y * y, axis=-1, keepdims=True) * n_inv
    var = mean_sq - mean * mean
    z = (y - mean) * lax.rsqrt(var + eps)
    z = z * g_ref[...] + beta_ref[...]

    # ReLU
    z = jnp.maximum(z, 0.0)

    # Dropout (training only): unsigned integer-threshold compare, no float convert.
    if bits_ref is not None:
        keep = bits_ref[...] >= jnp.uint32(drop_threshold)
        z = jnp.where(keep, z * keep_scale, 0.0)

    o_ref[...] = z.astype(o_ref.dtype)


def _eval_kernel(x_ref, w_ref, b_ref, g_ref, beta_ref, o_ref, *, eps):
    _proj_head_body(x_ref, w_ref, b_ref, g_ref, beta_ref, o_ref, None,
                    eps=eps, drop_threshold=0, keep_scale=1.0)


def _train_kernel(x_ref, w_ref, b_ref, g_ref, beta_ref, bits_ref, o_ref,
                  *, eps, drop_threshold, keep_scale):
    _proj_head_body(x_ref, w_ref, b_ref, g_ref, beta_ref, o_ref, bits_ref,
                    eps=eps, drop_threshold=drop_threshold, keep_scale=keep_scale)


# ---------------------------------------------------------------------------
# Tiling / wrapper
# ---------------------------------------------------------------------------
def _round_up(a, b):
    return (a + b - 1) // b * b


def _choose_tm(M, K, N, elem_bytes, vmem_budget=24 * 1024 * 1024):
    """Pick the largest row tile that keeps weight + double-buffered tiles in budget."""
    m8 = _round_up(max(M, 1), 8)
    w_bytes = K * N * elem_bytes
    avail = max(vmem_budget - w_bytes, 2 * 1024 * 1024)
    # TODO(synk): if the resident (K, N) weight itself exceeds the VMEM budget,
    # the K dimension should be tiled with an f32 accumulator instead.
    for tm in (1024, 512, 256, 128, 64, 32, 16, 8):
        if tm > m8:
            continue
        # double-buffered x tile (compute dtype) + output tile (f32) + bits tile (u32)
        tile_bytes = 2 * tm * (K * elem_bytes + 2 * N * 4)
        if tile_bytes <= avail:
            return tm
    return 8


def projection_head(x, w, b, gamma, beta, *, eps=1e-5, dropout_p=0.1,
                    training=False, rng_key=None, tm=None,
                    compute_dtype=jnp.bfloat16):
    """x: (M, K); w: (K, N); b/gamma/beta: (N,). Returns (M, N) in x.dtype."""
    M, K = x.shape
    Kw, N = w.shape
    assert K == Kw, "weight shape mismatch"
    out_dtype = x.dtype
    elem_bytes = jnp.dtype(compute_dtype).itemsize

    if tm is None:
        tm = _choose_tm(M, K, N, elem_bytes)
    tm = max(8, (tm // 8) * 8)
    Mp = pl.cdiv(M, tm) * tm

    xc = x.astype(compute_dtype)
    if Mp != M:
        xc = jnp.pad(xc, ((0, Mp - M), (0, 0)))
    wc = w.astype(compute_dtype)
    b2 = b.reshape(1, N).astype(jnp.float32)
    g2 = gamma.reshape(1, N).astype(jnp.float32)
    beta2 = beta.reshape(1, N).astype(jnp.float32)

    grid = (Mp // tm,)

    # Explicit VMEM budgeting: resident weight + double-buffered x / out / bits tiles.
    est = (K * N * elem_bytes
           + 2 * tm * (K * elem_bytes + 2 * N * 4)
           + 3 * N * 4)
    vmem_limit = int(min(max(2 * est, 32 * 1024 * 1024), 64 * 1024 * 1024))
    compiler_params = pltpu.CompilerParams(
        dimension_semantics=("parallel",),   # batch rows are independent -> megacore
        vmem_limit_bytes=vmem_limit)

    x_spec = pl.BlockSpec((tm, K), lambda i: (i, 0))
    w_spec = pl.BlockSpec((K, N), lambda i: (0, 0))       # weight resident in VMEM
    vec_spec = pl.BlockSpec((1, N), lambda i: (0, 0))
    out_spec = pl.BlockSpec((tm, N), lambda i: (i, 0))
    out_shape = jax.ShapeDtypeStruct((Mp, N), out_dtype)

    use_dropout = bool(training) and dropout_p > 0.0
    if use_dropout:
        if rng_key is None:
            rng_key = jax.random.PRNGKey(0)
        bits = jax.random.bits(rng_key, (Mp, N), dtype=jnp.uint32)
        drop_threshold = min(int(round(dropout_p * (1 << 32))), (1 << 32) - 1)
        kernel = functools.partial(
            _train_kernel, eps=eps, drop_threshold=drop_threshold,
            keep_scale=1.0 / (1.0 - dropout_p))
        out = pl.pallas_call(
            kernel,
            out_shape=out_shape,
            grid_spec=pltpu.PrefetchScalarGridSpec(
                num_scalar_prefetch=0,
                grid=grid,
                in_specs=[x_spec, w_spec, vec_spec, vec_spec, vec_spec,
                          pl.BlockSpec((tm, N), lambda i: (i, 0))],
                out_specs=out_spec),
            compiler_params=compiler_params,
        )(xc, wc, b2, g2, beta2, bits)
    else:
        kernel = functools.partial(_eval_kernel, eps=eps)
        out = pl.pallas_call(
            kernel,
            out_shape=out_shape,
            grid_spec=pltpu.PrefetchScalarGridSpec(
                num_scalar_prefetch=0,
                grid=grid,
                in_specs=[x_spec, w_spec, vec_spec, vec_spec, vec_spec],
                out_specs=out_spec),
            compiler_params=compiler_params,
        )(xc, wc, b2, g2, beta2)

    return out[:M] if Mp != M else out


# ---------------------------------------------------------------------------
# Pure-JAX reference (same bf16 inputs / f32 accumulation as the kernel)
# ---------------------------------------------------------------------------
def projection_head_ref(x, w, b, gamma, beta, eps=1e-5, compute_dtype=jnp.bfloat16):
    y = jnp.dot(x.astype(compute_dtype), w.astype(compute_dtype),
                preferred_element_type=jnp.float32) + b
    mean = jnp.mean(y, axis=-1, keepdims=True)
    var = jnp.mean((y - mean) ** 2, axis=-1, keepdims=True)
    z = (y - mean) / jnp.sqrt(var + eps) * gamma + beta
    return jnp.maximum(z, 0.0)


if __name__ == "__main__":
    # Small shapes consistent with the module: batch=16, input_dim=32, output_dim=128.
    M, K, N = 16, 32, 128
    key = jax.random.PRNGKey(0)
    kx, kw, kb, kd = jax.random.split(key, 4)

    x = jax.random.normal(kx, (M, K), dtype=jnp.float32)
    # Deterministic synthetic parameters (not a checkpoint load).
    w = jax.random.normal(kw, (K, N), dtype=jnp.float32) * (1.0 / K) ** 0.5
    b = jax.random.normal(kb, (N,), dtype=jnp.float32) * 0.01
    gamma = jnp.ones((N,), dtype=jnp.float32)
    beta = jnp.zeros((N,), dtype=jnp.float32)

    # Eval path (matches nn.Dropout in eval mode: identity).
    out = jax.block_until_ready(projection_head(x, w, b, gamma, beta, training=False))
    ref = projection_head_ref(x, w, b, gamma, beta)
    assert out.shape == (M, N)
    assert jnp.allclose(out, ref, atol=2e-2, rtol=2e-2), "mismatch vs reference (eval)"

    # Ragged batch (M not divisible by the tile): exercises the pad + slice path.
    M2 = 13
    out2 = jax.block_until_ready(
        projection_head(x[:M2], w, b, gamma, beta, training=False))
    assert out2.shape == (M2, N)
    assert jnp.allclose(out2, ref[:M2], atol=2e-2, rtol=2e-2), "mismatch vs reference (ragged)"

    # Training path: dropout mask from host-side uint32 bits, applied in-kernel.
    out_train = jax.block_until_ready(
        projection_head(x, w, b, gamma, beta, training=True, rng_key=kd))
    assert out_train.shape == (M, N)
    assert bool(jnp.all(jnp.isfinite(out_train)))

    print("KERNEL_OK")
</pallas_src>

<mosaic_0001>
module attributes {stable_mosaic.version = 11 : i64} {
  func.func @_eval_kernel(%arg0: i32, %arg1: memref<16x32xbf16, #tpu.memory_space<vmem>>, %arg2: memref<32x128xbf16, #tpu.memory_space<vmem>>, %arg3: memref<1x128xf32, #tpu.memory_space<vmem>>, %arg4: memref<1x128xf32, #tpu.memory_space<vmem>>, %arg5: memref<1x128xf32, #tpu.memory_space<vmem>>, %arg6: memref<16x128xf32, #tpu.memory_space<vmem>>) attributes {dimension_semantics = [#tpu.dimension_semantics<parallel>], iteration_bounds = array<i64: 1>, scalar_prefetch = 0 : i64, scratch_operands = 0 : i64, tpu.core_type = #tpu.core_type<tc>, window_params = [{transform_indices = @transform_0, window_bounds = array<i64: 16, 32>}, {pipeline_mode = #tpu.pipeline_mode<synchronous>, transform_indices = @transform_1, window_bounds = array<i64: 32, 128>}, {pipeline_mode = #tpu.pipeline_mode<synchronous>, transform_indices = @transform_2, window_bounds = array<i64: 1, 128>}, {pipeline_mode = #tpu.pipeline_mode<synchronous>, transform_indices = @transform_3, window_bounds = array<i64: 1, 128>}, {pipeline_mode = #tpu.pipeline_mode<synchronous>, transform_indices = @transform_4, window_bounds = array<i64: 1, 128>}, {transform_indices = @transform_5, window_bounds = array<i64: 16, 128>}]} {
    %c0 = arith.constant 0 : index
    %c0_0 = arith.constant 0 : index
    %0 = vector.load %arg1[%c0, %c0_0] : memref<16x32xbf16, #tpu.memory_space<vmem>>, vector<16x32xbf16>
    %c0_1 = arith.constant 0 : index
    %c0_2 = arith.constant 0 : index
    %1 = vector.load %arg2[%c0_1, %c0_2] : memref<32x128xbf16, #tpu.memory_space<vmem>>, vector<32x128xbf16>
    %cst = arith.constant dense<0.000000e+00> : vector<16x128xf32>
    %2 = tpu.matmul %0, %1, %cst {dimension_numbers = #tpu.dot_dimension_numbers<[1], [0], [0], [1], [0, 0, 1, 1], [], []>} : vector<16x32xbf16>, vector<32x128xbf16>, vector<16x128xf32> -> vector<16x128xf32>
    %c0_3 = arith.constant 0 : index
    %c0_4 = arith.constant 0 : index
    %3 = vector.load %arg3[%c0_3, %c0_4] : memref<1x128xf32, #tpu.memory_space<vmem>>, vector<1x128xf32>
    %4 = vector.broadcast %3 : vector<1x128xf32> to vector<16x128xf32>
    %5 = arith.addf %2, %4 : vector<16x128xf32>
    %cst_5 = arith.constant dense<0.000000e+00> : vector<16xf32>
    %6 = vector.multi_reduction <add>, %5, %cst_5 [1] : vector<16x128xf32> to vector<16xf32>
    %7 = vector.shape_cast %6 : vector<16xf32> to vector<16x1xf32>
    %cst_6 = arith.constant 7.812500e-03 : f32
    %8 = vector.broadcast %cst_6 : f32 to vector<16x1xf32>
    %9 = arith.mulf %7, %8 : vector<16x1xf32>
    %10 = arith.mulf %5, %5 : vector<16x128xf32>
    %cst_7 = arith.constant dense<0.000000e+00> : vector<16xf32>
    %11 = vector.multi_reduction <add>, %10, %cst_7 [1] : vector<16x128xf32> to vector<16xf32>
    %12 = vector.shape_cast %11 : vector<16xf32> to vector<16x1xf32>
    %cst_8 = arith.constant 7.812500e-03 : f32
    %13 = vector.broadcast %cst_8 : f32 to vector<16x1xf32>
    %14 = arith.mulf %12, %13 : vector<16x1xf32>
    %15 = arith.mulf %9, %9 : vector<16x1xf32>
    %16 = arith.subf %14, %15 : vector<16x1xf32>
    %17 = vector.broadcast %9 : vector<16x1xf32> to vector<16x128xf32>
    %18 = arith.subf %5, %17 : vector<16x128xf32>
    %cst_9 = arith.constant 9.99999974E-6 : f32
    %19 = vector.broadcast %cst_9 : f32 to vector<16x1xf32>
    %20 = arith.addf %16, %19 : vector<16x1xf32>
    %21 = math.rsqrt %20 : vector<16x1xf32>
    %22 = vector.broadcast %21 : vector<16x1xf32> to vector<16x128xf32>
    %23 = arith.mulf %18, %22 : vector<16x128xf32>
    %c0_10 = arith.constant 0 : index
    %c0_11 = arith.constant 0 : index
    %24 = vector.load %arg4[%c0_10, %c0_11] : memref<1x128xf32, #tpu.memory_space<vmem>>, vector<1x128xf32>
    %25 = vector.broadcast %24 : vector<1x128xf32> to vector<16x128xf32>
    %26 = arith.mulf %23, %25 : vector<16x128xf32>
    %c0_12 = arith.constant 0 : index
    %c0_13 = arith.constant 0 : index
    %27 = vector.load %arg5[%c0_12, %c0_13] : memref<1x128xf32, #tpu.memory_space<vmem>>, vector<1x128xf32>
    %28 = vector.broadcast %27 : vector<1x128xf32> to vector<16x128xf32>
    %29 = arith.addf %26, %28 : vector<16x128xf32>
    %cst_14 = arith.constant 0.000000e+00 : f32
    %30 = vector.broadcast %cst_14 : f32 to vector<16x128xf32>
    %31 = arith.maximumf %29, %30 : vector<16x128xf32>
    %c0_15 = arith.constant 0 : index
    %c0_16 = arith.constant 0 : index
    %32 = vector.load %arg6[%c0_15, %c0_16] : memref<16x128xf32, #tpu.memory_space<vmem>>, vector<16x128xf32>
    tpu.vector_store %arg6[%c0_15, %c0_16], %31 {strides = array<i32>} : memref<16x128xf32, #tpu.memory_space<vmem>>, vector<16x128xf32>,
    return
  }
  func.func @transform_0(%arg0: i32) -> (i32, i32) {
    %c0_i32 = arith.constant 0 : i32
    %c0_i32_0 = arith.constant 0 : i32
    return %arg0, %c0_i32 : i32, i32
  }
  func.func @transform_1(%arg0: i32) -> (i32, i32) {
    %c0_i32 = arith.constant 0 : i32
    %c0_i32_0 = arith.constant 0 : i32
    %c0_i32_1 = arith.constant 0 : i32
    return %c0_i32, %c0_i32_0 : i32, i32
  }
  func.func @transform_2(%arg0: i32) -> (i32, i32) {
    %c0_i32 = arith.constant 0 : i32
    %c0_i32_0 = arith.constant 0 : i32
    %c0_i32_1 = arith.constant 0 : i32
    return %c0_i32, %c0_i32_0 : i32, i32
  }
  func.func @transform_3(%arg0: i32) -> (i32, i32) {
    %c0_i32 = arith.constant 0 : i32
    %c0_i32_0 = arith.constant 0 : i32
    %c0_i32_1 = arith.constant 0 : i32
    return %c0_i32, %c0_i32_0 : i32, i32
  }
  func.func @transform_4(%arg0: i32) -> (i32, i32) {
    %c0_i32 = arith.constant 0 : i32
    %c0_i32_0 = arith.constant 0 : i32
    %c0_i32_1 = arith.constant 0 : i32
    return %c0_i32, %c0_i32_0 : i32, i32
  }
  func.func @transform_5(%arg0: i32) -> (i32, i32) {
    %c0_i32 = arith.constant 0 : i32
    %c0_i32_0 = arith.constant 0 : i32
    return %arg0, %c0_i32 : i32, i32
  }
}

</mosaic_0001>

<bundles_post_ra>
// kernel: tpu_custom_call.1
= control target key start
LH: loop header
LB: loop body
LE: loop exit
PB: predicated region body
PF: predicated region fallthrough
CT: control target
= control target key end

     0   :  { %10 = vsyncpa [#allocation3], 0  ;;  %s381_s0 = inlined_call_operand.hbm [shape: bf16[16,32], index: 0, kind: input, shape index: {}]   ;;  %s382_s1 = inlined_call_operand.hbm [shape: bf16[32,128], index: 1, kind: input, shape index: {}]   ;;  %s383_s2 = inlined_call_operand.vmem [shape: f32[1,128], index: 2, kind: input, shape index: {}]   ;;  %s384_s3 = inlined_call_operand.vmem [shape: f32[1,128], index: 3, kind: input, shape index: {}]   ;;  %s385_s4 = inlined_call_operand.vmem [shape: f32[1,128], index: 4, kind: input, shape index: {}]   ;;  %s386_s5 = inlined_call_operand.hbm [shape: f32[16,128], index: 5, kind: output, shape index: {}]  }
   0x1   :  { %11 = vsyncpa [#allocation6], 0 }
   0x2   :  { %12 = vsyncpa [#allocation4], 0  ;;  %s297_s18 = smov [#allocation2]   ;;  %s225_s22 = scalar_lea.hbm %s381_s0, 128 }
   0x3   :  { %s18_s19 = sshll.u32 %s297_s18, 4  ;;  %p226_p0 = scmp.ne.s32.totalorder %s381_s0, %s225_s22  ;;  %s19_s19 = int_to_ptr.vmem [resolvable:$true] %s18_s19 }
   0x4   :  { %p229_p1 = scmp.lt.u32.totalorder %s225_s22, %s381_s0 }
   0x6   :  { %p231_p2 = pnand %p229_p1, %p226_p0 }
   0x8   :  { %234 = shalt.err (!%p231_p2)
}
   0x9   :  { %s235_s27 = scalar_lea.vmem %s19_s19, 128  ;;  %p240_p4 = scmp.lt.s32.totalorder %s19_s19, %s19_s19 }
   0xa   :  { %p236_p3 = scmp.ne.s32.totalorder %s19_s19, %s235_s27  ;;  %p241_p5 = scmp.lt.s32.totalorder %s235_s27, %s235_s27 }
   0xc   :  { %p242_p6 = por %p241_p5, %p240_p4 }
   0xe   :  { %p243_p7 = pnand %p242_p6, %p236_p3 }
  0x10   :  { %246 = shalt.err (!%p243_p7)
}
  0x11   :  { %s298_s28 = smov 64   ;;  %s299_s29 = smov 4  }
  0x12   :  { %24 = dma.hbm_to_vmem [thread:$0]  %s381_s0, 128, %s19_s19, [#allocation3], %s298_s28, %s298_s28, %s299_s29  }
  0x13   :  { %s300_s7 = smov [#allocation5]   ;;  %s247_s11 = scalar_lea.hbm %s382_s1, 256 }
  0x14   :  { %s30_s8 = sshll.u32 %s300_s7, 4  ;;  %p248_p8 = scmp.ne.s32.totalorder %s382_s1, %s247_s11  ;;  %s31_s8 = int_to_ptr.vmem [resolvable:$true] %s30_s8 }
  0x15   :  { %p251_p9 = scmp.lt.u32.totalorder %s247_s11, %s382_s1 }
  0x17   :  { %p253_p10 = pnand %p251_p9, %p248_p8 }
  0x19   :  { %256 = shalt.err (!%p253_p10)
}
  0x1a   :  { %s257_s16 = scalar_lea.vmem %s31_s8, 256  ;;  %p262_p12 = scmp.lt.s32.totalorder %s31_s8, %s31_s8 }
  0x1b   :  { %p258_p11 = scmp.ne.s32.totalorder %s31_s8, %s257_s16  ;;  %p263_p13 = scmp.lt.s32.totalorder %s257_s16, %s257_s16 }
  0x1d   :  { %p264_p0 = por %p263_p13, %p262_p12 }
  0x1f   :  { %p265_p1 = pnand %p264_p0, %p258_p11 }
  0x21   :  { %268 = shalt.err (!%p265_p1)
}
  0x22   :  { %36 = dma.hbm_to_vmem [thread:$0]  %s382_s1, 256, %s31_s8, [#allocation6], %s298_s28, %s298_s28, %s299_s29  }
  0x23   :  { %291 = dma.done.wait [#allocation3], 128  }
  0x24   :  { %292 = vsyncadd [#allocation3], 4294967168 }
  0x25   :  { %293 = dma.done.wait [#allocation6], 256  }
  0x26   :  { %294 = vsyncadd [#allocation6], 4294967040  ;;  %v301_v0 = vmov 0.0   ;;  %vm302_vm0 = vmmov 0   ;;  %v218_v1 = vld [vmem:[#allocation5] sm:$0xff]   ;;  %v219_v2 = vld [vmem:[#allocation5 + $0x8] sm:$0xff]  }
  0x27   :  { %201 = vmatprep.subr.bf16.mxu0 %v301_v0  ;;  %205 = vmatprep.mubr.msk.bf16.mxu0 %vm302_vm0, %v301_v0  ;;  %v220_v3 = vld [vmem:[#allocation2] sm:$0xff]   ;;  %vm80_vm1 = vcmask 261120   ;;  %s303_s22 = smov [#allocation7]  }
  0x28   :  { %202 = vmatpush3.bf16.msra.mxu0 %v218_v1  ;;  %v191_v4 = vld [vmem:[%s383_s2] ss:$0 sm:$0xff]  ;;  %s178_s23 = sshll.u32 %s303_s22, 4  ;;  %s179_s23 = int_to_ptr.vmem [resolvable:$true] %s178_s23 }
  0x29   :  { %203 = vmatprep.subr.bf16.mxu0 %v301_v0  ;;  %v196_v29 = vld [vmem:[%s384_s3] ss:$0 sm:$0xff]  ;;  %s269_s3 = scalar_lea.vmem %s179_s23, 256  ;;  %p274_p3 = scmp.lt.s32.totalorder %s179_s23, %s179_s23 }
  0x2a   :  { %v197_v31 = vld [vmem:[%s385_s4] ss:$0 sm:$0xff]  ;;  %p270_p2 = scmp.ne.s32.totalorder %s179_s23, %s269_s3  ;;  %p275_p4 = scmp.lt.s32.totalorder %s269_s3, %s269_s3 }
  0x2c   :  { %204 = vmatpush3.bf16.msra.mxu0 %v219_v2  ;;  %p276_p5 = por %p275_p4, %p274_p3 }
  0x2e   :  { %p277_p6 = pnand %p276_p5, %p270_p2 }
  0x2f   :  { %206 = vmatmul.mubr.msk.bf16.vlgmr.msra.gmra.mrb[0].mxu0 %vm80_vm1, %v220_v3 }
 0x102   :  { %v118_v5 = vpop.f32.mrb[0].mxu0 }
 0x103   :  { %v119_v6 = vadd.f32 %v191_v4, %v118_v5  ;;  %v207_v7 = vpop.f32.mrb[1].mxu0 }
 0x104   :  { %v121_v8 = vpop.f32.mrb[2].mxu0 }
 0x105   :  { %v122_v9 = vadd.f32 %v191_v4, %v121_v8  ;;  %125 = vadd.xlane.f32.xlu0 %v119_v6  ;;  %v208_v10 = vpop.f32.mrb[3].mxu0  ;;  %v131_v11 = vmul.f32 %v119_v6, %v119_v6 }
 0x107   :  { %133 = vadd.xlane.f32.xlu1 %v131_v11  ;;  %v132_v12 = vmul.f32 %v122_v9, %v122_v9 }
 0x109   :  { %127 = vadd.xlane.f32.xlu0 %v122_v9 }
 0x10b   :  { %135 = vadd.xlane.f32.xlu1 %v132_v12 }
 0x192   :  { %v126_v13 = vpop.xlane.xlu0 %125 }
 0x193   :  { %v129_v14 = vmul.f32 0.0078125, %v126_v13 }
 0x194   :  { %v134_v15 = vpop.xlane.xlu1 %133 }
 0x195   :  { %v139_v16 = vmul.f32 %v129_v14, %v129_v14  ;;  %v137_v17 = vmul.f32 0.0078125, %v134_v15  ;;  %v143_v27 = vsub.f32 %v119_v6, %v129_v14 }
 0x196   :  { %v128_v18 = vpop.xlane.xlu0 %127 }
 0x197   :  { %v141_v19 = vsub.f32 %v137_v17, %v139_v16  ;;  %v130_v20 = vmul.f32 0.0078125, %v128_v18 }
 0x198   :  { %v136_v21 = vpop.xlane.xlu1 %135 }
 0x199   :  { %v145_v22 = vadd.f32 1e-05, %v141_v19  ;;  %v140_v23 = vmul.f32 %v130_v20, %v130_v20  ;;  %v138_v24 = vmul.f32 0.0078125, %v136_v21  ;;  %v144_v32 = vsub.f32 %v122_v9, %v130_v20 }
 0x19b   :  { %221 = vrsqrt.f32 %v145_v22  ;;  %v142_v25 = vsub.f32 %v138_v24, %v140_v23 }
 0x19d   :  { %v146_v26 = vadd.f32 1e-05, %v142_v25 }
 0x19f   :  { %223 = vrsqrt.f32 %v146_v26 }
 0x1a5   :  { %v222_v28 = vpop.eup %221 }
 0x1a6   :  { %v149_v30 = vmul.f32 %v222_v28, %v143_v27 }
 0x1a8   :  { %v158_v33 = vmul.f32 %v196_v29, %v149_v30 }
 0x1a9   :  { %v224_v34 = vpop.eup %223 }
 0x1aa   :  { %v150_v35 = vmul.f32 %v224_v34, %v144_v32  ;;  %v167_v36 = vadd.f32 %v197_v31, %v158_v33 }
 0x1ac   :  { %v159_v37 = vmul.f32 %v196_v29, %v150_v35  ;;  %v169_v38 = vmax.f32 %v167_v36, 0.0 }
 0x1ae   :  { %v168_v39 = vadd.f32 %v197_v31, %v159_v37  ;;  %171 = vst [vmem:[#allocation7] sm:$0xff] %v169_v38 }
 0x1b0   :  { %v170_v40 = vmax.f32 %v168_v39, 0.0 }
 0x1b2   :  { %172 = vst [vmem:[#allocation7 + $0x8] sm:$0xff] %v170_v40 }
 0x1b3   :  { %280 = shalt.err (!%p277_p6)
}
 0x1b4   :  { %s281_s25 = scalar_lea.hbm %s386_s5, 256 }
 0x1b5   :  { %p282_p7 = scmp.ne.s32.totalorder %s386_s5, %s281_s25  ;;  %p285_p8 = scmp.lt.u32.totalorder %s281_s25, %s386_s5 }
 0x1b7   :  { %p287_p9 = pnand %p285_p8, %p282_p7 }
 0x1b9   :  { %290 = shalt.err (!%p287_p9)
}
 0x1ba   :  { %s304_s30 = smov 128   ;;  %s305_s6 = smov 8  }
 0x1bb   :  { %184 = dma.vmem_to_hbm [thread:$0]  %s179_s23, 256, %s386_s5, [#allocation4], %s304_s30, %s304_s30, %s305_s6  }
 0x1bc   :  { %295 = dma.done.wait [#allocation4], 256  }
 0x1bd   :  { %296 = vsyncadd [#allocation4], 4294967040 }
 0x1be   :  { %188 = vsyncpa [#allocation3], 1 }
 0x1bf   :  { %189 = vsyncpa [#allocation6], 1 }
 0x1c0   :  { %190 = vsyncpa [#allocation4], 1 }

</bundles_post_ra>
